<compile_context>
chip_gen: v7x
topology: tpu7x:2x2x1
jax: 0.10.0
libtpu: 0.0.40
codegen_flags: <defaults>
</compile_context>

<pallas_src>
import jax
import jax.numpy as jnp
from jax.experimental import pallas as pl
from jax.experimental.pallas import tpu as pltpu

EPS = 1e-6


def _final_layer_kernel(x_ref, w_ref, b_ref, o_ref):
    # x_ref: (TN, H)   token tile for batch b
    # w_ref: (H, D)    per-batch folded weight:  (1 + scale_b) * W
    # b_ref: (1, D)    per-batch folded bias:    shift_b @ W + bias   (f32)
    # o_ref: (TN, D)   output tile (unpadded; D == full array dim)
    x = x_ref[...].astype(jnp.float32)                     # (TN, H)

    # LayerNorm, no affine, eps=1e-6 (two-pass centered variance; compute has
    # slack because the kernel is HBM-read bound on x).
    mean = jnp.mean(x, axis=-1, keepdims=True)
    xc = x - mean
    var = jnp.mean(xc * xc, axis=-1, keepdims=True)
    xn = xc * jax.lax.rsqrt(var + EPS)                      # (TN, H) f32

    # Modulation is folded into w_ref / b_ref, so go straight to the MXU.
    # Matmul in the weight's native dtype (bf16 MXU when bf16 weights are
    # supplied), f32 accumulation.
    out = jnp.dot(xn.astype(w_ref.dtype), w_ref[...],
                  preferred_element_type=jnp.float32)       # (TN, D)
    out = out + b_ref[...]
    o_ref[...] = out.astype(o_ref.dtype)


def _vmem_capacity_bytes():
    """Physical VMEM per TensorCore (64 MiB on v7x, 128 MiB on v5e/v6e)."""
    try:
        info = pltpu.get_tpu_info()
        cap = getattr(info, "vmem_capacity_bytes", None)
        if cap:
            return int(cap)
    except Exception:
        pass
    return 64 << 20   # conservative fallback (v7x per-TC VMEM)


def _pick_tn(B, N, H, D, x_dtype, out_dtype, w_dtype, vmem_limit_bytes):
    """Pick a token tile: multiple of the sublane packing for x's dtype,
    divides N, fits the VMEM plan (x/out double-buffers + resident per-batch
    weight + f32 temporaries), and keeps the parallel grid-step count >= 2 and
    even so megacore (v7x: 2 TCs) splits evenly."""
    isx = jnp.dtype(x_dtype).itemsize
    iso = jnp.dtype(out_dtype).itemsize
    isw = jnp.dtype(w_dtype).itemsize
    align = 16 if isx < 4 else 8

    # Bytes that do not scale with tn: double-buffered per-batch weight + bias.
    fixed = 2 * (H * D * isw + D * 4)
    # Bytes per token of tile: x double-buffer + out double-buffer + ~4 f32
    # (tn, H) compute temporaries (LN intermediates / casts).
    per_tok = 2 * H * isx + 2 * D * iso + 4 * H * 4
    budget = max(vmem_limit_bytes - fixed, per_tok * align)
    cap = (budget // per_tok) // align * align
    cap = max(align, min(cap, N))

    best = None
    t = align
    while t <= cap:
        if N % t == 0:
            best = t
        t += align
    if best is None:
        return N                                  # tiny / unaligned N: full block

    # Keep the parallel grid-step count >= 2 and even for 2-TC chips, as long
    # as the tile stays big enough to amortize the ~0.35 us per-step overhead.
    steps = B * (N // best)
    needs_split = steps < 2 or (steps % 2 == 1 and best >= 1024)
    if needs_split and best % 2 == 0 and (best // 2) % align == 0:
        best //= 2
    return best


def t2i_final_layer(x, t, scale_shift_table, weight_t, bias, *,
                    tn=None, weight_dtype=None, vmem_limit_bytes=None):
    """x: (B, N, H), t: (B, H), scale_shift_table: (2, H),
    weight_t: (H, D) (pre-transposed nn.Linear weight), bias: (D,).
    Returns (B, N, D).

    weight_dtype: optional dtype for the MXU operands (e.g. jnp.bfloat16 on
    v6e/v7x when the model ships f32 weights); default keeps weight_t.dtype.
    """
    B, N, H = x.shape
    D = weight_t.shape[1]

    # Fold the t2i modulation into per-batch matmul operands (wrapper-side,
    # tiny:  B*H*D elements):
    #   (xn*(1+scale_b) + shift_b) @ W + bias
    #     == xn @ ((1+scale_b)[:, None] * W)  +  (shift_b @ W + bias)
    tf = t.astype(jnp.float32)
    sst = scale_shift_table.astype(jnp.float32)
    shift = sst[0][None, :] + tf                 # (B, H)
    scale1 = 1.0 + sst[1][None, :] + tf          # (B, H)
    wf = weight_t.astype(jnp.float32)
    w_dtype = weight_dtype if weight_dtype is not None else weight_t.dtype
    w_b = (scale1[:, :, None] * wf[None]).astype(w_dtype)                # (B, H, D)
    b_b = (shift @ wf + bias.astype(jnp.float32))[:, None, :]            # (B, 1, D) f32

    # Generation-aware VMEM plan.
    vmem_cap = _vmem_capacity_bytes()
    if vmem_limit_bytes is None:
        # ~48 MiB on 64 MiB/TC parts (v7x), ~96 MiB on 128 MiB parts (v5e/v6e).
        vmem_limit_bytes = min(int(vmem_cap * 3 // 4), 100 << 20)
    if tn is None:
        tn = _pick_tn(B, N, H, D, x.dtype, x.dtype, w_b.dtype, vmem_limit_bytes)
    assert N % tn == 0, (N, tn)

    grid = (B, N // tn)

    # NOTE: per-batch weight/bias are small (H*D), so double-buffering them is
    # negligible VMEM; pl.Buffered(1) is not needed now that they vary with b.
    out = pl.pallas_call(
        _final_layer_kernel,
        out_shape=jax.ShapeDtypeStruct((B, N, D), x.dtype),
        grid_spec=pltpu.PrefetchScalarGridSpec(
            num_scalar_prefetch=0,
            grid=grid,
            in_specs=[
                pl.BlockSpec((None, tn, H), lambda b, i: (b, i, 0)),   # x
                pl.BlockSpec((None, H, D), lambda b, i: (b, 0, 0)),    # (1+scale)*W
                pl.BlockSpec((None, 1, D), lambda b, i: (b, 0, 0)),    # shift@W + bias
            ],
            out_specs=pl.BlockSpec((None, tn, D), lambda b, i: (b, i, 0)),
        ),
        compiler_params=pltpu.CompilerParams(
            dimension_semantics=("parallel", "parallel"),
            vmem_limit_bytes=vmem_limit_bytes,
        ),
    )(x, w_b, b_b)
    return out


def t2i_final_layer_ref(x, t, scale_shift_table, weight_t, bias):
    """Pure-JAX reference matching the PyTorch module's forward."""
    xf = x.astype(jnp.float32)
    shift_scale = (scale_shift_table[None].astype(jnp.float32)
                   + t[:, None].astype(jnp.float32))
    shift = shift_scale[:, 0:1, :]     # (B, 1, H)
    scale = shift_scale[:, 1:2, :]     # (B, 1, H)
    mean = jnp.mean(xf, axis=-1, keepdims=True)
    var = jnp.mean((xf - mean) ** 2, axis=-1, keepdims=True)
    xn = (xf - mean) * jax.lax.rsqrt(var + EPS)
    xm = xn * (1.0 + scale) + shift
    out = xm @ weight_t.astype(jnp.float32) + bias.astype(jnp.float32)
    return out.astype(x.dtype)


if __name__ == "__main__":
    # Small, TPU-friendly shapes consistent with the module's forward.
    B = 2              # batch
    N = 64             # tokens (sequence)
    H = 128            # hidden_size
    P = 2              # patch_size
    C_OUT = 4          # out_channels
    D = P * P * C_OUT  # linear output dim = 16

    key = jax.random.PRNGKey(0)
    kx, kt, ksst, kw, kb = jax.random.split(key, 5)

    x = jax.random.normal(kx, (B, N, H), dtype=jnp.float32)
    t = jax.random.normal(kt, (B, H), dtype=jnp.float32)

    # Parameters (deterministic synthetic init, shapes per module __init__).
    scale_shift_table = jax.random.normal(ksst, (2, H), dtype=jnp.float32) / (H ** 0.5)
    weight_t = jax.random.normal(kw, (H, D), dtype=jnp.float32) * (1.0 / (H ** 0.5))
    bias = jax.random.normal(kb, (D,), dtype=jnp.float32) * 0.01

    out = t2i_final_layer(x, t, scale_shift_table, weight_t, bias)
    out = jax.block_until_ready(out)

    ref = t2i_final_layer_ref(x, t, scale_shift_table, weight_t, bias)
    assert out.shape == (B, N, D), out.shape
    assert jnp.allclose(out, ref, atol=1e-4, rtol=1e-4), "mismatch vs reference"

    print("KERNEL_OK")
</pallas_src>

<mosaic_0001>
module attributes {stable_mosaic.version = 11 : i64} {
  func.func @_final_layer_kernel(%arg0: i32, %arg1: i32, %arg2: memref<1x64x128xf32, #tpu.memory_space<vmem>>, %arg3: memref<1x128x16xf32, #tpu.memory_space<vmem>>, %arg4: memref<1x1x16xf32, #tpu.memory_space<vmem>>, %arg5: memref<1x64x16xf32, #tpu.memory_space<vmem>>) attributes {dimension_semantics = [#tpu.dimension_semantics<parallel>, #tpu.dimension_semantics<parallel>], iteration_bounds = array<i64: 2, 1>, scalar_prefetch = 0 : i64, scratch_operands = 0 : i64, tpu.core_type = #tpu.core_type<tc>, window_params = [{transform_indices = @transform_0, window_bounds = array<i64: 1, 64, 128>}, {transform_indices = @transform_1, window_bounds = array<i64: 1, 128, 16>}, {transform_indices = @transform_2, window_bounds = array<i64: 1, 1, 16>}, {transform_indices = @transform_3, window_bounds = array<i64: 1, 64, 16>}]} {
    %c0 = arith.constant 0 : index
    %c0_0 = arith.constant 0 : index
    %c0_1 = arith.constant 0 : index
    %0 = vector.load %arg2[%c0, %c0_0, %c0_1] : memref<1x64x128xf32, #tpu.memory_space<vmem>>, vector<1x64x128xf32>
    %1 = vector.shape_cast %0 : vector<1x64x128xf32> to vector<64x128xf32>
    %cst = arith.constant dense<0.000000e+00> : vector<64xf32>
    %2 = vector.multi_reduction <add>, %1, %cst [1] : vector<64x128xf32> to vector<64xf32>
    %3 = vector.shape_cast %2 : vector<64xf32> to vector<64x1xf32>
    %cst_2 = arith.constant 1.280000e+02 : f32
    %4 = vector.broadcast %cst_2 : f32 to vector<64x1xf32>
    %5 = arith.divf %3, %4 : vector<64x1xf32>
    %6 = vector.broadcast %5 : vector<64x1xf32> to vector<64x128xf32>
    %7 = arith.subf %1, %6 : vector<64x128xf32>
    %8 = arith.mulf %7, %7 : vector<64x128xf32>
    %cst_3 = arith.constant dense<0.000000e+00> : vector<64xf32>
    %9 = vector.multi_reduction <add>, %8, %cst_3 [1] : vector<64x128xf32> to vector<64xf32>
    %10 = vector.shape_cast %9 : vector<64xf32> to vector<64x1xf32>
    %cst_4 = arith.constant 1.280000e+02 : f32
    %11 = vector.broadcast %cst_4 : f32 to vector<64x1xf32>
    %12 = arith.divf %10, %11 : vector<64x1xf32>
    %cst_5 = arith.constant 9.99999997E-7 : f32
    %13 = vector.broadcast %cst_5 : f32 to vector<64x1xf32>
    %14 = arith.addf %12, %13 : vector<64x1xf32>
    %15 = math.rsqrt %14 : vector<64x1xf32>
    %16 = vector.broadcast %15 : vector<64x1xf32> to vector<64x128xf32>
    %17 = arith.mulf %7, %16 : vector<64x128xf32>
    %c0_6 = arith.constant 0 : index
    %c0_7 = arith.constant 0 : index
    %c0_8 = arith.constant 0 : index
    %18 = vector.load %arg3[%c0_6, %c0_7, %c0_8] : memref<1x128x16xf32, #tpu.memory_space<vmem>>, vector<1x128x16xf32>
    %19 = vector.shape_cast %18 : vector<1x128x16xf32> to vector<128x16xf32>
    %cst_9 = arith.constant dense<0.000000e+00> : vector<64x16xf32>
    %20 = tpu.matmul %17, %19, %cst_9 {dimension_numbers = #tpu.dot_dimension_numbers<[1], [0], [0], [1], [0, 0, 1, 1], [], []>} : vector<64x128xf32>, vector<128x16xf32>, vector<64x16xf32> -> vector<64x16xf32>
    %c0_10 = arith.constant 0 : index
    %c0_11 = arith.constant 0 : index
    %c0_12 = arith.constant 0 : index
    %21 = vector.load %arg4[%c0_10, %c0_11, %c0_12] : memref<1x1x16xf32, #tpu.memory_space<vmem>>, vector<1x1x16xf32>
    %22 = vector.shape_cast %21 : vector<1x1x16xf32> to vector<1x16xf32>
    %23 = vector.broadcast %22 : vector<1x16xf32> to vector<64x16xf32>
    %24 = arith.addf %20, %23 : vector<64x16xf32>
    %c0_13 = arith.constant 0 : index
    %c0_14 = arith.constant 0 : index
    %c0_15 = arith.constant 0 : index
    %25 = vector.load %arg5[%c0_13, %c0_14, %c0_15] : memref<1x64x16xf32, #tpu.memory_space<vmem>>, vector<1x64x16xf32>
    %26 = vector.shape_cast %25 : vector<1x64x16xf32> to vector<64x16xf32>
    %27 = vector.shape_cast %24 : vector<64x16xf32> to vector<1x64x16xf32>
    tpu.vector_store %arg5[%c0_13, %c0_14, %c0_15], %27 {strides = array<i32>} : memref<1x64x16xf32, #tpu.memory_space<vmem>>, vector<1x64x16xf32>,
    return
  }
  func.func @transform_0(%arg0: i32, %arg1: i32) -> (i32, i32, i32) {
    %c0_i32 = arith.constant 0 : i32
    %c0_i32_0 = arith.constant 0 : i32
    return %arg0, %arg1, %c0_i32 : i32, i32, i32
  }
  func.func @transform_1(%arg0: i32, %arg1: i32) -> (i32, i32, i32) {
    %c0_i32 = arith.constant 0 : i32
    %c0_i32_0 = arith.constant 0 : i32
    %c0_i32_1 = arith.constant 0 : i32
    return %arg0, %c0_i32, %c0_i32_0 : i32, i32, i32
  }
  func.func @transform_2(%arg0: i32, %arg1: i32) -> (i32, i32, i32) {
    %c0_i32 = arith.constant 0 : i32
    %c0_i32_0 = arith.constant 0 : i32
    %c0_i32_1 = arith.constant 0 : i32
    return %arg0, %c0_i32, %c0_i32_0 : i32, i32, i32
  }
  func.func @transform_3(%arg0: i32, %arg1: i32) -> (i32, i32, i32) {
    %c0_i32 = arith.constant 0 : i32
    %c0_i32_0 = arith.constant 0 : i32
    return %arg0, %arg1, %c0_i32 : i32, i32, i32
  }
}

</mosaic_0001>

<bundles_post_ra>
// kernel: tpu_custom_call.1
= control target key start
LH: loop header
LB: loop body
LE: loop exit
PB: predicated region body
PF: predicated region fallthrough
CT: control target
= control target key end

     0   :  { %s803_s12 = smov 0   ;;  %s805_s13 = smov 0   ;;  %s917_s0 = inlined_call_operand.vmem [shape: f32[2,64,128], index: 0, kind: input, shape index: {}]   ;;  %s918_s1 = inlined_call_operand.vmem [shape: f32[2,128,16], index: 1, kind: input, shape index: {}]   ;;  %s919_s2 = inlined_call_operand.vmem [shape: f32[2,1,16], index: 2, kind: input, shape index: {}]   ;;  %s920_s3 = inlined_call_operand.vmem [shape: f32[2,64,16], index: 3, kind: output, shape index: {}]  }
   0x1   :  { %s807_s14 = smov 0  }
   0x2 LB: > { %s25_s15 = sadd.s32 1, %s777_s13  ;;  %p590_p0 = scmp.ge.s32.totalorder %s781_s14, 1  ;;  %s781_s14 = sphi %s807_s14, %s13_s14   ;;  %s777_s13 = sphi %s805_s13, %s922_s13   ;;  %s773_s12 = sphi %s803_s12, %s921_s12  }
   0x3   : > { %p27_p1 = scmp.ge.s32.totalorder %s25_s15, 2  ;;  %p176_p2 = scmp.lt.s32.totalorder %s781_s14, 3 }
   0x5   : > { %s924_s15 = smov (%p27_p1, %s25_s15), 0  ;;  %p177_p3 = pnand %p590_p0, %p176_p2 }
   0x6   : > { %p217_p4 = scmp.lt.s32.totalorder (!%p177_p3), %s773_s12, 1  ;;  %vm469_vm0 = vcmask (!%p177_p3), 130048  }
   0x7   : > { %180 = sbr.rel (%p177_p3) target bundleno = 557 (0x22d), region = 32 }
   0xe   : > { %s926_s12 = smov (!%p217_p4, %s773_s12), 1 }
   0xf   : > { %s600_s16 = sshll.u32 %s926_s12, 6  ;;  %s601_s20 = sshll.u32 %s926_s12, 7 }
  0x10   : > { %s224_s19 = scalar_lea.vmem %s917_s0, %s600_s16  ;;  %s833_s23 = scalar_lea.vmem %s918_s1, %s601_s20 }
  0x11   : > { %v244_v0 = vld [vmem:[%s224_s19] sm:$0xff]  ;;  %v245_v1 = vld [vmem:[%s224_s19 + $0x8] sm:$0xff]  ;;  %v246_v4 = vld [vmem:[%s224_s19 + $0x10] sm:$0xff]  ;;  %s233_s26 = scalar_lea.vmem %s919_s2, %s926_s12  ;;  %s242_s29 = scalar_lea.vmem %s920_s3, %s600_s16 }
  0x12   : > { %252 = vadd.xlane.f32.xlu0 %v244_v0  ;;  %254 = vadd.xlane.f32.xlu1 %v245_v1  ;;  %v248_v2 = vld [vmem:[%s224_s19 + $0x20] sm:$0xff]  ;;  %v249_v3 = vld [vmem:[%s224_s19 + $0x28] sm:$0xff]  ;;  %v250_v5 = vld [vmem:[%s224_s19 + $0x30] sm:$0xff] }
  0x13   : > { %v247_v6 = vld [vmem:[%s224_s19 + $0x18] sm:$0xff]  ;;  %v341_v8 = vld [vmem:[%s833_s23] sm:$0xff]  ;;  %v342_v9 = vld [vmem:[%s833_s23 + $0x8] sm:$0xff] }
  0x14   : > { %v251_v7 = vld [vmem:[%s224_s19 + $0x38] sm:$0xff]  ;;  %v343_v10 = vld [vmem:[%s833_s23 + $0x10] sm:$0xff]  ;;  %v671_v11 = vpack.c.bf16 %v342_v9, %v341_v8  ;;  %v345_v14 = vld [vmem:[%s833_s23 + $0x20] sm:$0xff] }
  0x15   : > { %v344_v12 = vld [vmem:[%s833_s23 + $0x18] sm:$0xff]  ;;  %v346_v15 = vld [vmem:[%s833_s23 + $0x28] sm:$0xff]  ;;  %v347_v49 = vld [vmem:[%s833_s23 + $0x30] sm:$0xff] }
  0x16   : > { %260 = vadd.xlane.f32.xlu0 %v248_v2  ;;  %262 = vadd.xlane.f32.xlu1 %v249_v3  ;;  %v675_v13 = vpack.c.bf16 %v344_v12, %v343_v10  ;;  %v679_v16 = vpack.c.bf16 %v346_v15, %v345_v14  ;;  %v348_v50 = vld [vmem:[%s833_s23 + $0x38] sm:$0xff]  ;;  %v349_v52 = vld [vmem:[%s833_s23 + $0x40] sm:$0xff]  ;;  %v350_v53 = vld [vmem:[%s833_s23 + $0x48] sm:$0xff] }
  0x17   : > { %672 = vmatprep.subr.bf16.mxu0 %v671_v11  ;;  %703 = vmatprep.subr.bf16.mxu1 %v671_v11  ;;  %v683_v51 = vpack.c.bf16 %v348_v50, %v347_v49  ;;  %v687_v54 = vpack.c.bf16 %v350_v53, %v349_v52  ;;  %v351_v55 = vld [vmem:[%s833_s23 + $0x50] sm:$0xff]  ;;  %v352_v56 = vld [vmem:[%s833_s23 + $0x58] sm:$0xff]  ;;  %v353_v58 = vld [vmem:[%s833_s23 + $0x60] sm:$0xff] }
  0x18   : > { %674 = vmatpush3.bf16.msra.mxu0 %v671_v11  ;;  %711 = vmatpush3.bf16.msra.mxu1 %v671_v11  ;;  %v691_v57 = vpack.c.bf16 %v352_v56, %v351_v55  ;;  %v354_v59 = vld [vmem:[%s833_s23 + $0x68] sm:$0xff]  ;;  %v355_v61 = vld [vmem:[%s833_s23 + $0x70] sm:$0xff]  ;;  %v356_v62 = vld [vmem:[%s833_s23 + $0x78] sm:$0xff] }
  0x19   : > { %676 = vmatprep.subr.bf16.mxu0 %v675_v13  ;;  %704 = vmatprep.subr.bf16.mxu1 %v675_v13  ;;  %v695_v60 = vpack.c.bf16 %v354_v59, %v353_v58  ;;  %v699_v63 = vpack.c.bf16 %v356_v62, %v355_v61 }
  0x1a   : > { %256 = vadd.xlane.f32.xlu0 %v246_v4  ;;  %264 = vadd.xlane.f32.xlu1 %v250_v5 }
  0x1c   : > { %678 = vmatpush3.bf16.msra.mxu0 %v675_v13  ;;  %712 = vmatpush3.bf16.msra.mxu1 %v675_v13 }
  0x1d   : > { %680 = vmatprep.subr.bf16.mxu0 %v679_v16  ;;  %705 = vmatprep.subr.bf16.mxu1 %v679_v16 }
  0x1e   : > { %258 = vadd.xlane.f32.xlu0 %v247_v6  ;;  %266 = vadd.xlane.f32.xlu1 %v251_v7 }
  0x20   : > { %682 = vmatpush3.bf16.msra.mxu0 %v679_v16  ;;  %713 = vmatpush3.bf16.msra.mxu1 %v679_v16 }
  0x21   : > { %684 = vmatprep.subr.bf16.mxu0 %v683_v51  ;;  %706 = vmatprep.subr.bf16.mxu1 %v683_v51 }
  0x24   : > { %686 = vmatpush3.bf16.msra.mxu0 %v683_v51  ;;  %714 = vmatpush3.bf16.msra.mxu1 %v683_v51 }
  0x25   : > { %688 = vmatprep.subr.bf16.mxu0 %v687_v54  ;;  %707 = vmatprep.subr.bf16.mxu1 %v687_v54 }
  0x28   : > { %690 = vmatpush3.bf16.msra.mxu0 %v687_v54  ;;  %715 = vmatpush3.bf16.msra.mxu1 %v687_v54 }
  0x29   : > { %692 = vmatprep.subr.bf16.mxu0 %v691_v57  ;;  %708 = vmatprep.subr.bf16.mxu1 %v691_v57 }
  0x2c   : > { %694 = vmatpush3.bf16.msra.mxu0 %v691_v57  ;;  %716 = vmatpush3.bf16.msra.mxu1 %v691_v57 }
  0x2d   : > { %696 = vmatprep.subr.bf16.mxu0 %v695_v60  ;;  %709 = vmatprep.subr.bf16.mxu1 %v695_v60 }
  0x30   : > { %698 = vmatpush3.bf16.msra.mxu0 %v695_v60  ;;  %717 = vmatpush3.bf16.msra.mxu1 %v695_v60 }
  0x31   : > { %700 = vmatprep.subr.bf16.mxu0 %v699_v63  ;;  %710 = vmatprep.subr.bf16.mxu1 %v699_v63 }
  0x34   : > { %702 = vmatpush3.bf16.msra.mxu0 %v699_v63  ;;  %718 = vmatpush3.bf16.msra.mxu1 %v699_v63 }
  0x9f   : > { %v253_v17 = vpop.xlane.xlu0 %252  ;;  %v255_v18 = vpop.xlane.xlu1 %254 }
  0xa0   : > { %v269_v19 = vmul.f32 0.0078125, %v253_v17  ;;  %v270_v20 = vmul.f32 0.0078125, %v255_v18 }
  0xa2   : > { %v841_v21 = vsub.f32 %v244_v0, %v269_v19  ;;  %v843_v22 = vsub.f32 %v245_v1, %v270_v20 }
  0xa3   : > { %v261_v23 = vpop.xlane.xlu0 %260  ;;  %v263_v24 = vpop.xlane.xlu1 %262 }
  0xa4   : > { %v273_v25 = vmul.f32 0.0078125, %v261_v23  ;;  %v285_v26 = vmul.f32 %v841_v21, %v841_v21  ;;  %v274_v27 = vmul.f32 0.0078125, %v263_v24  ;;  %v286_v30 = vmul.f32 %v843_v22, %v843_v22 }
  0xa6   : > { %v847_v28 = vsub.f32 %v248_v2, %v273_v25  ;;  %293 = vadd.xlane.f32.xlu0 %v285_v26  ;;  %v849_v29 = vsub.f32 %v249_v3, %v274_v27 }
  0xa7   : > { %v257_v31 = vpop.xlane.xlu0 %256  ;;  %v265_v32 = vpop.xlane.xlu1 %264 }
  0xa8   : > { %v271_v33 = vmul.f32 0.0078125, %v257_v31  ;;  %v289_v34 = vmul.f32 %v847_v28, %v847_v28  ;;  %v275_v35 = vmul.f32 0.0078125, %v265_v32  ;;  %v290_v38 = vmul.f32 %v849_v29, %v849_v29 }
  0xaa   : > { %v855_v36 = vsub.f32 %v246_v4, %v271_v33  ;;  %295 = vadd.xlane.f32.xlu0 %v286_v30  ;;  %301 = vadd.xlane.f32.xlu1 %v289_v34  ;;  %v857_v37 = vsub.f32 %v250_v5, %v275_v35 }
  0xab   : > { %v259_v39 = vpop.xlane.xlu0 %258  ;;  %v267_v40 = vpop.xlane.xlu1 %266 }
  0xac   : > { %v272_v41 = vmul.f32 0.0078125, %v259_v39  ;;  %v287_v42 = vmul.f32 %v855_v36, %v855_v36  ;;  %v276_v43 = vmul.f32 0.0078125, %v267_v40  ;;  %v291_v46 = vmul.f32 %v857_v37, %v857_v37 }
  0xae   : > { %v863_v44 = vsub.f32 %v247_v6, %v272_v41  ;;  %303 = vadd.xlane.f32.xlu1 %v290_v38  ;;  %297 = vadd.xlane.f32.xlu0 %v287_v42  ;;  %v865_v45 = vsub.f32 %v251_v7, %v276_v43 }
  0xb0   : > { %v288_v47 = vmul.f32 %v863_v44, %v863_v44  ;;  %v292_v48 = vmul.f32 %v865_v45, %v865_v45 }
  0xb2   : > { %305 = vadd.xlane.f32.xlu1 %v291_v46  ;;  %299 = vadd.xlane.f32.xlu0 %v288_v47 }
  0xb6   : > { %307 = vadd.xlane.f32.xlu1 %v292_v48 }
 0x133   : > { %v294_v0 = vpop.xlane.xlu0 %293 }
 0x134   : > { %v309_v1 = vmul.f32 0.0078125, %v294_v0 }
 0x136   : > { %v317_v2 = vadd.f32 1e-06, %v309_v1 }
 0x137   : > { %v302_v3 = vpop.xlane.xlu1 %301  ;;  %v296_v4 = vpop.xlane.xlu0 %295 }
 0x138   : > { %743 = vrsqrt.f32 %v317_v2  ;;  %v313_v5 = vmul.f32 0.0078125, %v302_v3  ;;  %v310_v6 = vmul.f32 0.0078125, %v296_v4 }
 0x13a   : > { %v321_v7 = vadd.f32 1e-06, %v313_v5  ;;  %v318_v8 = vadd.f32 1e-06, %v310_v6 }
 0x13b   : > { %v304_v9 = vpop.xlane.xlu1 %303  ;;  %v298_v10 = vpop.xlane.xlu0 %297 }
 0x13c   : > { %745 = vrsqrt.f32 %v321_v7  ;;  %v314_v11 = vmul.f32 0.0078125, %v304_v9  ;;  %v311_v12 = vmul.f32 0.0078125, %v298_v10 }
 0x13d   : > { %747 = vrsqrt.f32 %v318_v8 }
 0x13e   : > { %v322_v13 = vadd.f32 1e-06, %v314_v11  ;;  %v319_v14 = vadd.f32 1e-06, %v311_v12 }
 0x13f   : > { %v306_v15 = vpop.xlane.xlu1 %305  ;;  %v300_v16 = vpop.xlane.xlu0 %299 }
 0x140   : > { %749 = vrsqrt.f32 %v322_v13  ;;  %v315_v17 = vmul.f32 0.0078125, %v306_v15  ;;  %v312_v18 = vmul.f32 0.0078125, %v300_v16 }
 0x141   : > { %751 = vrsqrt.f32 %v319_v14 }
 0x142   : > { %v744_v19 = vpop.eup %743  ;;  %v323_v20 = vadd.f32 1e-06, %v315_v17  ;;  %v320_v23 = vadd.f32 1e-06, %v312_v18 }
 0x143   : > { %v308_v24 = vpop.xlane.xlu1 %307  ;;  %v333_v25 = vmul.f32 %v744_v19, %v841_v21 }
 0x144   : > { %753 = vrsqrt.f32 %v323_v20  ;;  %v316_v26 = vmul.f32 0.0078125, %v308_v24 }
 0x145   : > { %755 = vrsqrt.f32 %v320_v23  ;;  %659 = vmatprep.mubr.f32.mxu0 %v333_v25 }
 0x146   : > { %v746_v27 = vpop.eup %745  ;;  %v324_v30 = vadd.f32 1e-06, %v316_v26 }
 0x147   : > { %v748_v31 = vpop.eup %747  ;;  %v337_v32 = vmul.f32 %v746_v27, %v847_v28 }
 0x148   : > { %757 = vrsqrt.f32 %v324_v30  ;;  %v334_v33 = vmul.f32 %v748_v31, %v843_v22 }
 0x149   : > { %665 = vmatprep.mubr.f32.mxu1 %v337_v32 }
 0x14a   : > { %v750_v34 = vpop.eup %749  ;;  %660 = vmatmul.mubr.f32.vlgmr.msra.gmra.mrb[0].mxu0 %v334_v33 }
 0x14b   : > { %v752_v35 = vpop.eup %751  ;;  %v338_v21 = vmul.f32 %v750_v34, %v849_v29  ;;  %v597_v29 = vld [vmem:[%s233_s26] ss:$0 sm:$0xff] }
 0x14c   : > { %v335_v38 = vmul.f32 %v752_v35, %v855_v36 }
 0x14d   : > { %666 = vmatmul.mubr.f32.vlgmr.msra.gmra.mrb[0].mxu1 %v338_v21 }
 0x14e   : > { %v754_v39 = vpop.eup %753  ;;  %662 = vmatprep.mubr.f32.mxu0 %v335_v38 }
 0x14f   : > { %v756_v40 = vpop.eup %755  ;;  %v339_v41 = vmul.f32 %v754_v39, %v857_v37 }
 0x150   : > { %v336_v28 = vmul.f32 %v756_v40, %v863_v44 }
 0x151   : > { %668 = vmatprep.mubr.f32.mxu1 %v339_v41 }
 0x152   : > { %v758_v22 = vpop.eup %757  ;;  %663 = vmatmul.mubr.f32.gmra.mrb[2].mxu0 %v336_v28 }
 0x153   : > { %v340_v42 = vmul.f32 %v758_v22, %v865_v45 }
 0x155   : > { %669 = vmatmul.mubr.f32.gmra.mrb[2].mxu1 %v340_v42 }
 0x21d   : > { %v661_v36 = vpop.f32.mrb[0].mxu0 }
 0x21e   : > { %v436_v37 = vadd.f32 %v661_v36, %v597_v29  ;;  %v430_v43 = vpop.f32.mrb[1].mxu0 }
 0x21f   : > { %v431_v44 = vadd.f32 %v597_v29, %v430_v43 }
 0x220   : > { %471 = vst.msk [vmem:[%s242_s29 + $0x8] sm:$0xff] %vm469_vm0, %v436_v37  ;;  %v667_v46 = vpop.f32.mrb[0].mxu1 }
 0x221   : > { %470 = vst.msk [vmem:[%s242_s29] sm:$0xff] %vm469_vm0, %v431_v44  ;;  %v456_v45 = vadd.f32 %v667_v46, %v597_v29  ;;  %v450_v47 = vpop.f32.mrb[1].mxu1 }
 0x222   : > { %v451_v48 = vadd.f32 %v597_v29, %v450_v47 }
 0x223   : > { %475 = vst.msk [vmem:[%s242_s29 + $0x28] sm:$0xff] %vm469_vm0, %v456_v45 }
 0x224   : > { %474 = vst.msk [vmem:[%s242_s29 + $0x20] sm:$0xff] %vm469_vm0, %v451_v48 }
 0x225   : > { %v664_v49 = vpop.f32.mrb[2].mxu0 }
 0x226   : > { %v446_v50 = vadd.f32 %v664_v49, %v597_v29  ;;  %v440_v51 = vpop.f32.mrb[3].mxu0 }
 0x227   : > { %v441_v52 = vadd.f32 %v597_v29, %v440_v51 }
 0x228   : > { %473 = vst.msk [vmem:[%s242_s29 + $0x18] sm:$0xff] %vm469_vm0, %v446_v50  ;;  %v670_v53 = vpop.f32.mrb[2].mxu1 }
 0x229   : > { %472 = vst.msk [vmem:[%s242_s29 + $0x10] sm:$0xff] %vm469_vm0, %v441_v52  ;;  %v466_v54 = vadd.f32 %v670_v53, %v597_v29  ;;  %v460_v55 = vpop.f32.mrb[3].mxu1 }
 0x22a   : > { %v461_v56 = vadd.f32 %v597_v29, %v460_v55 }
 0x22b   : > { %477 = vst.msk [vmem:[%s242_s29 + $0x38] sm:$0xff] %vm469_vm0, %v466_v54 }
 0x22c   : > { %476 = vst.msk [vmem:[%s242_s29 + $0x30] sm:$0xff] %vm469_vm0, %v461_v56 }
 0x22d PF: > { %s13_s14 = sadd.s32 1, %s781_s14   ;;  %s921_s12 = smov %s777_s13 }
 0x22e   : > { %p10_p5 = scmp.ge.s32.totalorder %s13_s14, 4   ;;  %s922_s13 = smov %s924_s15 }
 0x230   :  { %12 = sbr.rel (!%p10_p5) target bundleno = 2 (0x2), region = 68 }

</bundles_post_ra>
